<compile_context>
chip_gen: v7x
topology: tpu7x:2x2x1
jax: 0.10.0
libtpu: 0.0.40
codegen_flags: <defaults>
</compile_context>

<pallas_src>
import math

import jax
import jax.numpy as jnp
from jax.experimental import pallas as pl
from jax.experimental.pallas import tpu as pltpu


_LANE = 128
_MIN_GRID_STEPS = 4          # >= 2 steps per TensorCore after v7x megacore split
_MIN_PALLAS_BYTES = 1 << 20  # below this, fused XLA matmul beats kernel launch cost
_MAX_VPU_BASES = 16          # unrolled broadcast-FMA up to this many bases


def _round_up(x, m):
    return ((x + m - 1) // m) * m


def _round_down(x, m):
    return (x // m) * m


def _tpu_vmem_capacity_bytes():
    try:
        return int(pltpu.get_tpu_info().vmem_capacity_bytes)
    except Exception:
        return 64 * 1024 * 1024  # conservative: smallest per-core VMEM (v7x)


def _basis_kernel_mxu(wcomp_ref, wflat_ref, out_ref):
    # wcomp_ref : (num_outputs, num_bases)  -- full, resident every grid step
    # wflat_ref : (num_bases, tile_k)       -- K-tile of flattened bases
    # out_ref   : (num_outputs, tile_k)     -- K-tile of composed weights
    out_ref[...] = jnp.dot(
        wcomp_ref[...].astype(jnp.float32),
        wflat_ref[...].astype(jnp.float32),
        preferred_element_type=jnp.float32,
    ).astype(out_ref.dtype)


def _make_basis_kernel_vpu(num_bases):
    # With tiny num_bases the MXU would run at <1% utilization; an unrolled VPU
    # broadcast-FMA keeps the work on VALU slots that are free under the DMA.
    # Dtype upcasts happen here (not in the wrapper) so bf16/mixed inputs do not
    # pay an extra wrapper-side HBM pass; accumulation is f32.
    def kernel(wcomp_ref, wflat_ref, out_ref):
        wcomp = wcomp_ref[...].astype(jnp.float32)   # (O, B)
        wflat = wflat_ref[...].astype(jnp.float32)   # (B, tile_k)
        acc = wcomp[:, 0:1] * wflat[0:1, :]
        for b in range(1, num_bases):
            acc = acc + wcomp[:, b : b + 1] * wflat[b : b + 1, :]
        out_ref[...] = acc.astype(out_ref.dtype)

    return kernel


def weight_basis_forward(w_comp, weight, shape, *, min_pallas_bytes=_MIN_PALLAS_BYTES):
    """Compose weights: returns (num_outputs, *shape)."""
    num_outputs, num_bases = w_comp.shape
    k = int(math.prod(shape))
    out_dtype = jnp.result_type(w_comp.dtype, weight.dtype)
    in_b = jnp.dtype(weight.dtype).itemsize
    comp_b = jnp.dtype(w_comp.dtype).itemsize
    out_b = jnp.dtype(out_dtype).itemsize

    w_flat = weight.reshape(num_bases, k)   # contiguous view; cast happens in-kernel
    out_shape = (num_outputs,) + tuple(shape)

    total_hbm_bytes = k * (num_bases * in_b + num_outputs * out_b)
    if num_bases == 0 or k == 0 or total_hbm_bytes <= min_pallas_bytes:
        # Tiny problem: pallas_call launch overhead dominates; let XLA fuse it.
        return jnp.matmul(w_comp, w_flat).astype(out_dtype).reshape(out_shape)

    # ---- generation-aware VMEM limit & per-step byte target -----------------
    vmem_phys = _tpu_vmem_capacity_bytes()
    vmem_limit = min(vmem_phys // 2, 64 * 1024 * 1024)  # 64 MiB v5e/v6e, 32 MiB v7x
    tile_budget = vmem_limit // 2                        # headroom for scratch/spills
    # Higher HBM BW (v7x, 64 MiB VMEM) needs bigger steps to amortize the
    # ~0.35us per-step pipeline overhead.
    target_step_bytes = (2 << 20) if vmem_phys <= (64 << 20) else (1 << 20)

    # ---- tile selection (mem-bound: per-step byte target, VMEM-clamped) -----
    hbm_bytes_per_col = num_bases * in_b + num_outputs * out_b
    # Double-buffered in/out blocks plus in-kernel f32 temporaries
    # (upcast copy of the bases tile + the f32 accumulator).
    vmem_bytes_per_col = 2 * hbm_bytes_per_col + (num_bases + num_outputs) * 4
    vmem_cols = max(_LANE, _round_down(tile_budget // vmem_bytes_per_col, _LANE))
    target_cols = max(_LANE, _round_down(target_step_bytes // hbm_bytes_per_col, _LANE))

    k_pad128 = _round_up(k, _LANE)
    # Largest tile still yielding >= _MIN_GRID_STEPS steps, so the "parallel"
    # K axis gives each TensorCore >= 2 overlapped steps after megacore split.
    steps_cols = max(_LANE, _round_down(pl.cdiv(k_pad128, _MIN_GRID_STEPS), _LANE))

    tile_k = max(_LANE, min(vmem_cols, target_cols, steps_cols, k_pad128))
    grid_k = pl.cdiv(k, tile_k)   # final block may be ragged; Pallas masks OOB stores

    kernel = (
        _make_basis_kernel_vpu(num_bases)
        if num_bases <= _MAX_VPU_BASES
        else _basis_kernel_mxu
    )

    cost = pl.CostEstimate(
        flops=2 * num_outputs * num_bases * k,
        transcendentals=0,
        bytes_accessed=num_bases * k * in_b
        + num_outputs * k * out_b
        + num_outputs * num_bases * comp_b,
    )

    # NOTE: for 16-bit out_dtype with num_outputs not a multiple of the sublane
    # packing factor the output stores are partially packed; acceptable because
    # the kernel is DMA-bound and the common case (f32 params) is dense.
    out_flat = pl.pallas_call(
        kernel,
        out_shape=jax.ShapeDtypeStruct((num_outputs, k), out_dtype),
        grid_spec=pltpu.PrefetchScalarGridSpec(
            num_scalar_prefetch=0,
            grid=(grid_k,),
            in_specs=[
                # w_comp is tiny: constant block index -> resident, no re-DMA.
                pl.BlockSpec((num_outputs, num_bases), lambda j: (0, 0)),
                # flattened bases: tiled along K (lane axis).
                pl.BlockSpec((num_bases, tile_k), lambda j: (0, j)),
            ],
            out_specs=pl.BlockSpec((num_outputs, tile_k), lambda j: (0, j)),
        ),
        compiler_params=pltpu.CompilerParams(
            dimension_semantics=("parallel",),
            vmem_limit_bytes=vmem_limit,
        ),
        cost_estimate=cost,
    )(w_comp, w_flat)

    return out_flat.reshape(out_shape)


def _xavier_uniform(key, shape, gain):
    # Mirrors torch.nn.init.xavier_uniform_ fan computation.
    if len(shape) == 2:
        fan_out, fan_in = shape[0], shape[1]
    else:
        receptive = int(math.prod(shape[2:]))
        fan_in = shape[1] * receptive
        fan_out = shape[0] * receptive
    bound = gain * math.sqrt(6.0 / (fan_in + fan_out))
    return jax.random.uniform(key, shape, jnp.float32, -bound, bound)


def _reference(w_comp, weight, shape):
    num_outputs, num_bases = w_comp.shape
    wf = weight.reshape(num_bases, -1).astype(jnp.float32)
    return jnp.matmul(w_comp.astype(jnp.float32), wf).reshape(
        (num_outputs,) + tuple(shape)
    )


if __name__ == "__main__":
    key = jax.random.PRNGKey(0)
    gain = math.sqrt(2.0)  # calculate_gain('relu')
    num_bases, num_outputs = 4, 8

    # Case 1: small, lane-aligned K -> force the Pallas path.
    shape1 = (16, 32)                                 # K = 512
    key, kw, kc = jax.random.split(key, 3)
    weight1 = _xavier_uniform(kw, (num_bases,) + shape1, gain)
    w_comp1 = _xavier_uniform(kc, (num_outputs, num_bases), gain)
    out1 = jax.block_until_ready(
        weight_basis_forward(w_comp1, weight1, shape1, min_pallas_bytes=0))
    assert out1.shape == (num_outputs,) + shape1
    assert jnp.allclose(out1, _reference(w_comp1, weight1, shape1), atol=1e-5, rtol=1e-5)

    # Case 2: K not a multiple of 128 -> exercises the ragged final grid block.
    shape2 = (17, 30)                                 # K = 510
    key, kw, kc = jax.random.split(key, 3)
    weight2 = _xavier_uniform(kw, (num_bases,) + shape2, gain)
    w_comp2 = _xavier_uniform(kc, (num_outputs, num_bases), gain)
    out2 = jax.block_until_ready(
        weight_basis_forward(w_comp2, weight2, shape2, min_pallas_bytes=0))
    assert out2.shape == (num_outputs,) + shape2
    assert jnp.allclose(out2, _reference(w_comp2, weight2, shape2), atol=1e-5, rtol=1e-5)

    # Case 3: larger K -> default threshold; multi-step, byte-targeted tiles.
    shape3 = (64, 512)                                # K = 32768 (> 1 MiB traffic)
    key, kw, kc = jax.random.split(key, 3)
    weight3 = _xavier_uniform(kw, (num_bases,) + shape3, gain)
    w_comp3 = _xavier_uniform(kc, (num_outputs, num_bases), gain)
    out3 = jax.block_until_ready(weight_basis_forward(w_comp3, weight3, shape3))
    assert out3.shape == (num_outputs,) + shape3
    assert jnp.allclose(out3, _reference(w_comp3, weight3, shape3), atol=1e-5, rtol=1e-5)

    # Case 4: bf16 bases + f32 coefficients -> in-kernel upcast, f32 output.
    shape4 = (32, 256)                                # K = 8192
    key, kw, kc = jax.random.split(key, 3)
    weight4 = _xavier_uniform(kw, (num_bases,) + shape4, gain).astype(jnp.bfloat16)
    w_comp4 = _xavier_uniform(kc, (num_outputs, num_bases), gain)
    out4 = jax.block_until_ready(
        weight_basis_forward(w_comp4, weight4, shape4, min_pallas_bytes=0))
    assert out4.dtype == jnp.float32
    assert out4.shape == (num_outputs,) + shape4
    assert jnp.allclose(out4, _reference(w_comp4, weight4, shape4), atol=1e-4, rtol=1e-4)

    # Case 5: tiny problem with default threshold -> XLA fallback path.
    out5 = jax.block_until_ready(weight_basis_forward(w_comp1, weight1, shape1))
    assert jnp.allclose(out5, out1, atol=1e-5, rtol=1e-5)

    print("KERNEL_OK")
</pallas_src>

<mosaic_0001>
module attributes {stable_mosaic.version = 11 : i64} {
  func.func @kernel(%arg0: i32, %arg1: memref<8x4xf32, #tpu.memory_space<vmem>>, %arg2: memref<4x128xf32, #tpu.memory_space<vmem>>, %arg3: memref<8x128xf32, #tpu.memory_space<vmem>>) attributes {dimension_semantics = [#tpu.dimension_semantics<parallel>], iteration_bounds = array<i64: 4>, scalar_prefetch = 0 : i64, scratch_operands = 0 : i64, tpu.core_type = #tpu.core_type<tc>, window_params = [{pipeline_mode = #tpu.pipeline_mode<synchronous>, transform_indices = @transform_0, window_bounds = array<i64: 8, 4>}, {transform_indices = @transform_1, window_bounds = array<i64: 4, 128>}, {transform_indices = @transform_2, window_bounds = array<i64: 8, 128>}]} {
    %c0 = arith.constant 0 : index
    %c0_0 = arith.constant 0 : index
    %0 = vector.load %arg1[%c0, %c0_0] : memref<8x4xf32, #tpu.memory_space<vmem>>, vector<8x4xf32>
    %c0_1 = arith.constant 0 : index
    %c0_2 = arith.constant 0 : index
    %1 = vector.load %arg2[%c0_1, %c0_2] : memref<4x128xf32, #tpu.memory_space<vmem>>, vector<4x128xf32>
    %2 = vector.extract_strided_slice %0 {offsets = [0, 0], sizes = [8, 1], strides = [1, 1]} : vector<8x4xf32> to vector<8x1xf32>
    %3 = vector.extract_strided_slice %1 {offsets = [0, 0], sizes = [1, 128], strides = [1, 1]} : vector<4x128xf32> to vector<1x128xf32>
    %4 = vector.broadcast %2 : vector<8x1xf32> to vector<8x128xf32>
    %5 = vector.broadcast %3 : vector<1x128xf32> to vector<8x128xf32>
    %6 = arith.mulf %4, %5 : vector<8x128xf32>
    %7 = vector.extract_strided_slice %0 {offsets = [0, 1], sizes = [8, 1], strides = [1, 1]} : vector<8x4xf32> to vector<8x1xf32>
    %8 = vector.extract_strided_slice %1 {offsets = [1, 0], sizes = [1, 128], strides = [1, 1]} : vector<4x128xf32> to vector<1x128xf32>
    %9 = vector.broadcast %7 : vector<8x1xf32> to vector<8x128xf32>
    %10 = vector.broadcast %8 : vector<1x128xf32> to vector<8x128xf32>
    %11 = arith.mulf %9, %10 : vector<8x128xf32>
    %12 = arith.addf %6, %11 : vector<8x128xf32>
    %13 = vector.extract_strided_slice %0 {offsets = [0, 2], sizes = [8, 1], strides = [1, 1]} : vector<8x4xf32> to vector<8x1xf32>
    %14 = vector.extract_strided_slice %1 {offsets = [2, 0], sizes = [1, 128], strides = [1, 1]} : vector<4x128xf32> to vector<1x128xf32>
    %15 = vector.broadcast %13 : vector<8x1xf32> to vector<8x128xf32>
    %16 = vector.broadcast %14 : vector<1x128xf32> to vector<8x128xf32>
    %17 = arith.mulf %15, %16 : vector<8x128xf32>
    %18 = arith.addf %12, %17 : vector<8x128xf32>
    %19 = vector.extract_strided_slice %0 {offsets = [0, 3], sizes = [8, 1], strides = [1, 1]} : vector<8x4xf32> to vector<8x1xf32>
    %20 = vector.extract_strided_slice %1 {offsets = [3, 0], sizes = [1, 128], strides = [1, 1]} : vector<4x128xf32> to vector<1x128xf32>
    %21 = vector.broadcast %19 : vector<8x1xf32> to vector<8x128xf32>
    %22 = vector.broadcast %20 : vector<1x128xf32> to vector<8x128xf32>
    %23 = arith.mulf %21, %22 : vector<8x128xf32>
    %24 = arith.addf %18, %23 : vector<8x128xf32>
    %c0_3 = arith.constant 0 : index
    %c0_4 = arith.constant 0 : index
    %25 = vector.load %arg3[%c0_3, %c0_4] : memref<8x128xf32, #tpu.memory_space<vmem>>, vector<8x128xf32>
    tpu.vector_store %arg3[%c0_3, %c0_4], %24 {strides = array<i32>} : memref<8x128xf32, #tpu.memory_space<vmem>>, vector<8x128xf32>,
    return
  }
  func.func @transform_0(%arg0: i32) -> (i32, i32) {
    %c0_i32 = arith.constant 0 : i32
    %c0_i32_0 = arith.constant 0 : i32
    %c0_i32_1 = arith.constant 0 : i32
    return %c0_i32, %c0_i32_0 : i32, i32
  }
  func.func @transform_1(%arg0: i32) -> (i32, i32) {
    %c0_i32 = arith.constant 0 : i32
    %c0_i32_0 = arith.constant 0 : i32
    return %c0_i32, %arg0 : i32, i32
  }
  func.func @transform_2(%arg0: i32) -> (i32, i32) {
    %c0_i32 = arith.constant 0 : i32
    %c0_i32_0 = arith.constant 0 : i32
    return %c0_i32, %arg0 : i32, i32
  }
}

</mosaic_0001>

<bundles_post_ra>
// kernel: tpu_custom_call.1
= control target key start
LH: loop header
LB: loop body
LE: loop exit
PB: predicated region body
PF: predicated region fallthrough
CT: control target
= control target key end

     0   :  { %7 = vsyncpa [#allocation3], 0  ;;  %s635_s0 = inlined_call_operand.vmem [shape: f32[8,4], index: 0, kind: input, shape index: {}]   ;;  %s636_s1 = inlined_call_operand.hbm [shape: f32[4,512], index: 1, kind: input, shape index: {}]   ;;  %s637_s2 = inlined_call_operand.hbm [shape: f32[8,512], index: 2, kind: output, shape index: {}]  }
   0x1   :  { %9 = vsyncpa [#allocation3 + $0x1], 0 }
   0x2   :  { %10 = vsyncpa [#allocation4], 0 }
   0x3   :  { %12 = vsyncpa [#allocation4 + $0x1], 0  ;;  %s472_s9 = smov 0   ;;  %s474_s10 = smov 0  }
   0x4   :  { %s476_s11 = smov 0   ;;  %s478_s12 = smov 0  }
   0x5 LB: > { %s493_s13 = sadd.s32 4294967295, %s449_s12   ;;  %s286_s14 = sadd.s32 4294967294, %s449_s12   ;;  %s449_s12 = sphi %s478_s12, %s651_s12   ;;  %s445_s11 = sphi %s476_s11, %s650_s11   ;;  %s441_s10 = sphi %s474_s10, %s649_s10   ;;  %s437_s9 = sphi %s472_s9, %s648_s9  }
   0x6   : > { %s497_s15 = sadd.s32 1, %s449_s12   ;;  %s46_s16 = sadd.s32 1, %s445_s11 }
   0x7   : > { %s43_s17 = ssub.s32 %s449_s12, %s497_s15  ;;  %p53_p0 = scmp.ne.s32.totalorder %s445_s11, %s441_s10 }
   0x8   : > { %p44_p1 = scmp.eq.s32.totalorder %s43_s17, 0  ;;  %p54_p2 = scmp.eq.s32.totalorder %s449_s12, 0 }
   0x9   : > { %p59_p3 = scmp.ne.s32.totalorder %s441_s10, %s437_s9  ;;  %p60_p4 = scmp.eq.s32.totalorder %s493_s13, 0 }
   0xa   : > { %s509_s18 = scalar_select %p44_p1, %s445_s11, %s46_s16  }
   0xb   : > { %p511_p5 = por %p54_p2, %p53_p0  ;;  %p515_p6 = por %p60_p4, %p59_p3 }
   0xc   : > { %p83_p7 = scmp.eq.s32.totalorder %s493_s13, 3  ;;  %p89_p8 = scmp.eq.s32.totalorder %s286_s14, 3 }
   0xd   : > { %p310_p9 = scmp.lt.s32.totalorder %s449_s12, 4  ;;  %s112_s23 = sand.u32 1, %s445_s11  }
   0xe   : > { %p521_p10 = por %p83_p7, %p53_p0  ;;  %p525_p11 = por %p89_p8, %p59_p3 }
   0xf   : > { %s290_s24 = sshll.u32 %s449_s12, 6  ;;  %s289_s25 = sshll.u32 %s112_s23, 2 }
  0x10   : > { %s641_s21 = scalar_select %p521_p10, 1, 0 }
  0x11   : > { %s642_s22 = scalar_select %p525_p11, 1, 0 }
  0x12   : > { %s534_s28 = scalar_lea.hbm %s636_s1, %s290_s24  ;;  %s116_s29 = scalar_lea.vmem [#allocation2], %s289_s25 }
  0x13   : > { %s123_s30 = sshll.u32 %s116_s29, 4  ;;  %p538_p12 = pnand %p310_p9, %p511_p5  ;;  %s542_s30 = int_to_ptr.vmem [resolvable:$true] %s123_s30 }
  0x14   : > { %s113_s4 = scalar_lea.sflag [#allocation3], %s112_s23  ;;  %s353_s5 = scalar_lea.hbm %s534_s28, 64 }
  0x15   : > { %p354_p1 = scmp.ne.s32.totalorder %s534_s28, %s353_s5  ;;  %p355_p2 = pneg %p538_p12 }
  0x16   : > { %s358_s8 = scalar_lea.hbm %s636_s1, 256  ;;  %p359_p5 = scmp.lt.u32.totalorder %s534_s28, %s636_s1 }
  0x17   : > { %p356_p3 = pnand %p355_p2, %p354_p1  ;;  %p360_p7 = scmp.lt.u32.totalorder %s358_s8, %s353_s5 }
  0x18   : > { %p362_p9 = scmp.lt.u32.totalorder %s353_s5, %s534_s28 }
  0x19   : > { %p357_p4 = pneg %p356_p3  ;;  %p361_p8 = por %p360_p7, %p359_p5 }
  0x1b   : > { %p363_p13 = por %p362_p9, %p361_p8 }
  0x1d   : > { %p364_p0 = pnand %p363_p13, %p357_p4 }
  0x1f   : > { %367 = shalt.err (!%p364_p0)
}
  0x20   : > { %s368_s17 = scalar_lea.vmem %s542_s30, 64  ;;  %s451_s19 = smov [#allocation2]  }
  0x21   : > { %p369_p1 = scmp.ne.s32.totalorder %s542_s30, %s368_s17  ;;  %s373_s23 = sshll.u32 %s451_s19, 4  ;;  %s374_s23 = int_to_ptr.vmem [resolvable:$false] %s373_s23 }
  0x22   : > { %s375_s24 = scalar_lea.vmem %s374_s23, 128  ;;  %p376_p10 = scmp.lt.s32.totalorder %s542_s30, %s374_s23 }
  0x23   : > { %p371_p3 = pnand %p369_p1, %p355_p2  ;;  %p377_p5 = scmp.lt.s32.totalorder %s375_s24, %s368_s17 }
  0x25   : > { %p372_p11 = pneg %p371_p3  ;;  %p378_p7 = por %p377_p5, %p376_p10 }
  0x27   : > { %p379_p8 = pnand %p378_p7, %p372_p11 }
  0x29   : > { %382 = shalt.err (!%p379_p8)
}
  0x2a   : > { %305 = dma.hbm_to_vmem [thread:$0]  (!%p538_p12), %s534_s28, 64, %s542_s30, %s113_s4  }
  0x2b   : > { %p644_p13 = scmp.lt.s32.totalorder %s449_s12, 5  ;;  %p645_p0 = scmp.ge.s32.totalorder %s449_s12, 1 }
  0x2d   : > { %p129_p2 = pnand %p645_p0, %p644_p13 }
  0x2e   : > { %s576_s25 = sand.u32 (!%p129_p2), 1, %s441_s10  }
  0x2f   : > { %132 = sbr.rel (%p129_p2) target bundleno = 212 (0xd4), region = 28  ;;  %s292_s26 = sshll.u32 (!%p129_p2), %s576_s25, 2 }
  0x30   : > { %s135_s27 = scalar_lea.sflag (!%p129_p2), [#allocation3], %s576_s25  ;;  %s138_s29 = scalar_lea.vmem (!%p129_p2), [#allocation2], %s292_s26 }
  0x36   : > { %428 = dma.done.wait (%p515_p6), %s135_s27, 64  }
  0x37   : > { %430 = vsyncadd (%p515_p6), %s135_s27, 4294967232  ;;  %v452_v0 = vmov 0   ;;  %v453_v1 = vmov 2   ;;  %v159_v2 = vld [vmem:[%s635_s0] sm:$0xff]  ;;  %v454_v3 = vmov 1   ;;  %v455_v4 = vmov 3  }
  0x38   : > { %348 = vset.pattern.permute.xlu0 %v452_v0  ;;  %350 = vset.pattern.permute.xlu1 %v453_v1  ;;  %v166_v5 = vlaneseq  ;;  %v160_v9 = vld [vmem:[%s138_s29] sm:$0xf]  ;;  %s293_s20 = sshll.u32 %s576_s25, 3  ;;  %s295_s3 = sshll.u32 %s493_s13, 7 }
  0x39   : > { %163 = vperm.xlu0 %348, %v159_v2   ;;  %182 = vperm.xlu1 %350, %v159_v2   ;;  %s158_s4 = scalar_lea.vmem [#allocation5], %s293_s20  ;;  %s592_s8 = scalar_lea.hbm %s637_s2, %s295_s3 }
  0x3a   : > { %v167_v6 = vshrl.u32 %v166_v5, 7  ;;  %s216_s5 = sshll.u32 %s158_s4, 4  ;;  %s203_s14 = scalar_lea.sflag [#allocation4], %s576_s25  ;;  %s594_s5 = int_to_ptr.vmem [resolvable:$true] %s216_s5 }
  0x3b   : > { %s383_s16 = scalar_lea.vmem %s594_s5, 128  ;;  %p646_p10 = scmp.ne.s32.totalorder %s641_s21, 0 }
  0x3c   : > { %v168_v7 = vsub.s32 0, %v167_v6  ;;  %v177_v8 = vsub.s32 1, %v167_v6  ;;  %v187_v11 = vsub.s32 2, %v167_v6  ;;  %v197_v13 = vsub.s32 3, %v167_v6  ;;  %p384_p6 = scmp.ne.s32.totalorder %s594_s5, %s383_s16  ;;  %s456_s13 = smov [#allocation5]  }
  0x3d   : > { %349 = vset.pattern.permute.xlu0 %v454_v3  ;;  %351 = vset.pattern.permute.xlu1 %v455_v4  ;;  %s387_s17 = sshll.u32 %s456_s13, 4  ;;  %s388_s17 = int_to_ptr.vmem [resolvable:$false] %s387_s17 }
  0x3e   : > { %172 = vperm.xlu0 %349, %v159_v2   ;;  %192 = vperm.xlu1 %351, %v159_v2   ;;  %v169_v14 = vrot.slane %v160_v9, %v168_v7  ;;  %v178_v15 = vrot.slane %v160_v9, %v177_v8  ;;  %v188_v16 = vrot.slane %v160_v9, %v187_v11  ;;  %p385_p11 = pnand %p384_p6, %p646_p10  ;;  %s389_s19 = scalar_lea.vmem %s388_s17, 256 }
  0x3f   : > { %v198_v17 = vrot.slane %v160_v9, %v197_v13  ;;  %p390_p4 = scmp.lt.s32.totalorder %s594_s5, %s388_s17  ;;  %p391_p9 = scmp.lt.s32.totalorder %s389_s19, %s383_s16 }
  0x40   : > { %p386_p12 = pneg %p385_p11 }
  0x41   : > { %p392_p1 = por %p391_p9, %p390_p4 }
  0x42   : > { %352 = vset.pattern.permute.xlu0 %v455_v4 }
  0x43   : > { %p393_p3 = pnand %p392_p1, %p386_p12 }
  0xb8   : > { %v164_v10 = vpop.permute.xlu0 %163  ;;  %v183_v12 = vpop.permute.xlu1 %182 }
  0xb9   : > { %v170_v20 = vmul.f32 %v169_v14, %v164_v10  ;;  %v189_v22 = vmul.f32 %v188_v16, %v183_v12 }
  0xbd   : > { %v173_v18 = vpop.permute.xlu0 %172  ;;  %v193_v19 = vpop.permute.xlu1 %192 }
  0xbe   : > { %v179_v21 = vmul.f32 %v178_v15, %v173_v18  ;;  %v199_v24 = vmul.f32 %v198_v17, %v193_v19 }
  0xc0   : > { %v180_v23 = vadd.f32 %v179_v21, %v170_v20 }
  0xc2   : > { %v190_v25 = vadd.f32 %v189_v22, %v180_v23 }
  0xc4   : > { %v200_v26 = vadd.f32 %v199_v24, %v190_v25 }
  0xc6   : > { %201 = vst [vmem:[%s158_s4] sm:$0xff] %v200_v26 }
  0xc7   : > { %396 = shalt.err (!%p393_p3)
}
  0xc8   : > { %s397_s23 = scalar_lea.hbm %s592_s8, 128  ;;  %s401_s26 = scalar_lea.hbm %s637_s2, 512 }
  0xc9   : > { %p398_p5 = scmp.ne.s32.totalorder %s592_s8, %s397_s23  ;;  %p402_p13 = scmp.lt.u32.totalorder %s592_s8, %s637_s2 }
  0xca   : > { %p403_p0 = scmp.lt.u32.totalorder %s401_s26, %s397_s23  ;;  %p405_p6 = scmp.lt.u32.totalorder %s397_s23, %s592_s8 }
  0xcb   : > { %p399_p7 = pnand %p398_p5, %p646_p10 }
  0xcc   : > { %p404_p2 = por %p403_p0, %p402_p13 }
  0xcd   : > { %p400_p8 = pneg %p399_p7 }
  0xce   : > { %p406_p11 = por %p405_p6, %p404_p2 }
  0xd0   : > { %p407_p12 = pnand %p406_p11, %p400_p8 }
  0xd2   : > { %410 = shalt.err (!%p407_p12)
}
  0xd3   : > { %300 = dma.vmem_to_hbm [thread:$0]  (%p646_p10), %s594_s5, 128, %s592_s8, %s203_s14  }
  0xd4 PF: > { %p311_p4 = scmp.ge.s32.totalorder %s449_s12, 2  ;;  %s228_s28 = sand.u32 1, %s437_s9  }
  0xd5   : > { %p647_p9 = scmp.ne.s32.totalorder %s642_s22, 0  ;;  %s229_s30 = scalar_lea.sflag [#allocation4], %s228_s28 }
  0xd7   : > { %p307_p1 = pnand %p311_p4, %p647_p9 }
  0xd9   : > { %432 = dma.done.wait (!%p307_p1), %s229_s30, 128  }
  0xda   : > { %434 = vsyncadd (!%p307_p1), %s229_s30, 4294967168  ;;  %p15_p3 = scmp.ge.s32.totalorder %s497_s15, 6   ;;  %s648_s9 = smov %s441_s10 }
  0xdb   : > { %s649_s10 = smov %s445_s11  ;;  %s650_s11 = smov %s509_s18 }
  0xdc   : > { %s651_s12 = smov %s497_s15  ;;  %17 = sbr.rel (!%p15_p3) target bundleno = 5 (0x5), region = 73 }
  0xe3   :  { %234 = vsyncpa [#allocation3], 1 }
  0xe4   :  { %236 = vsyncpa [#allocation3 + $0x1], 1 }
  0xe5   :  { %237 = vsyncpa [#allocation4], 1 }
  0xe6   :  { %239 = vsyncpa [#allocation4 + $0x1], 1 }

</bundles_post_ra>
